<compile_context>
chip_gen: v6e
topology: v6e:2x2x1
jax: 0.10.0
libtpu: 0.0.40
codegen_flags: <defaults>
</compile_context>

<pallas_src>
import functools
import math

import jax
import jax.numpy as jnp
from jax.experimental import pallas as pl
from jax.experimental.pallas import tpu as pltpu

# ---- module hyper-parameters (the PyTorch module's globals) -----------------
CLASSES = 16
EMBEDDING_DIM = 32
M = 0.5  # ArcFace angular margin


def _arcface_kernel(x_ref, wt_ref, labels_ref, cls_ref, loss_ref, *, margin):
    # Load full tiles; cast in-kernel (no-op for f32 inputs).
    x = x_ref[...].astype(jnp.float32)       # [B, D]
    wt = wt_ref[...].astype(jnp.float32)     # [D, C]  (W pre-transposed)
    lab = labels_ref[...]                    # [B, 1] int32

    # Column-normalize W^T (== row-normalize W): rsqrt + multiply.
    # rsqrt rides the EUP slot; the multiply is VPU filler.
    norm_wt = wt * jax.lax.rsqrt(jnp.sum(wt * wt, axis=0, keepdims=True))  # [D, C]

    # ssq = ||x||^2 per row, kept as a column vector [B, 1].
    ssq = jnp.sum(x * x, axis=-1, keepdims=True)

    # raw = X @ norm_W^T == s * cos_thetas == classification_logits.
    # (identity: s * (x/s) . nw = x . nw, so X is fed to the MXU un-normalized;
    #  native [B,K]x[K,N] contraction, no transpose needed.)
    raw = jnp.dot(x, norm_wt, preferred_element_type=jnp.float32)          # [B, C]

    # one_hot(labels) via 2-D iota compare (TPU needs >=2D iota).
    col = jax.lax.broadcasted_iota(jnp.int32, raw.shape, 1)
    one_hot = col == lab                     # [B, C] bool

    # loss = s*cos(theta + one_hot*M)
    #      = raw - one_hot * (raw*(1 - cos M) + s*sin(theta)*sin M)
    # with s*sin(theta) = sqrt(max(s^2 - raw^2, 0))   (exact for s > 0).
    s_sin_theta = jnp.sqrt(jnp.maximum(ssq - raw * raw, 0.0))
    corr = (raw * jnp.float32(1.0 - math.cos(margin))
            + s_sin_theta * jnp.float32(math.sin(margin)))

    cls_ref[...] = raw
    loss_ref[...] = raw - jnp.where(one_hot, corr, jnp.float32(0.0))


def arcface_forward(X, W, labels, *, margin=M):
    """Returns (classification_logits, loss_logits), both [B, CLASSES] f32."""
    B, D = X.shape
    C = W.shape[0]
    assert W.shape == (C, D)
    labels2d = labels.reshape(B, 1).astype(jnp.int32)
    # One-time / constant-foldable for a parameter: feed the MXU a [D, C] RHS.
    Wt = jnp.transpose(W)

    vmem = pl.BlockSpec(memory_space=pltpu.MemorySpace.VMEM)
    cost = pl.CostEstimate(
        # matmul + W normalize (~3*C*D) + ssq (~3*B*D) + margin path (~8*B*C)
        flops=2 * B * C * D + 3 * C * D + 3 * B * D + 8 * B * C,
        transcendentals=C + B * C,           # rsqrt per W row + sqrt on [B,C]
        bytes_accessed=(B * D + C * D + B + 2 * B * C) * 4,
    )
    cls_logits, loss_logits = pl.pallas_call(
        functools.partial(_arcface_kernel, margin=margin),
        out_shape=(jax.ShapeDtypeStruct((B, C), jnp.float32),
                   jax.ShapeDtypeStruct((B, C), jnp.float32)),
        in_specs=[vmem, vmem, vmem],
        out_specs=(vmem, vmem),
        cost_estimate=cost,
    )(X, Wt, labels2d)
    return cls_logits, loss_logits


if __name__ == "__main__":
    B = 8
    key = jax.random.PRNGKey(0)
    kx, kw, kl = jax.random.split(key, 3)

    # Deterministic "parameter" W (stand-in for torch.randn init) and inputs.
    W = jax.random.normal(kw, (CLASSES, EMBEDDING_DIM), dtype=jnp.float32)
    X = jax.random.normal(kx, (B, EMBEDDING_DIM), dtype=jnp.float32)
    labels = jax.random.randint(kl, (B,), 0, CLASSES, dtype=jnp.int32)

    cls_logits, loss_logits = arcface_forward(X, W, labels)
    jax.block_until_ready((cls_logits, loss_logits))

    # Sanity check against a pure-JAX reference (same math as the PyTorch spec;
    # clip before arccos only to keep the reference finite under fp rounding).
    s = jnp.linalg.norm(X, axis=1, keepdims=True)
    nx = X / s
    nw = W / jnp.linalg.norm(W, axis=1, keepdims=True)
    cos_ref = nx @ nw.T
    oh = jax.nn.one_hot(labels, CLASSES, dtype=jnp.float32)
    cls_ref = s * cos_ref
    loss_ref = s * jnp.cos(jnp.arccos(jnp.clip(cos_ref, -1.0, 1.0)) + oh * M)
    assert jnp.allclose(cls_logits, cls_ref, atol=1e-3, rtol=1e-3)
    assert jnp.allclose(loss_logits, loss_ref, atol=1e-3, rtol=1e-3)

    print("KERNEL_OK")
</pallas_src>

<mosaic_0001>
module attributes {stable_mosaic.version = 11 : i64} {
  func.func @_arcface_kernel(%arg0: memref<8x32xf32, #tpu.memory_space<vmem>>, %arg1: memref<32x16xf32, #tpu.memory_space<vmem>>, %arg2: memref<8x1xi32, #tpu.memory_space<vmem>>, %arg3: memref<8x16xf32, #tpu.memory_space<vmem>>, %arg4: memref<8x16xf32, #tpu.memory_space<vmem>>) attributes {dimension_semantics = [], scalar_prefetch = 0 : i64, scratch_operands = 0 : i64, tpu.core_type = #tpu.core_type<tc>} {
    %c0 = arith.constant 0 : index
    %c0_0 = arith.constant 0 : index
    %0 = vector.load %arg0[%c0, %c0_0] : memref<8x32xf32, #tpu.memory_space<vmem>>, vector<8x32xf32>
    %c0_1 = arith.constant 0 : index
    %c0_2 = arith.constant 0 : index
    %1 = vector.load %arg1[%c0_1, %c0_2] : memref<32x16xf32, #tpu.memory_space<vmem>>, vector<32x16xf32>
    %c0_3 = arith.constant 0 : index
    %c0_4 = arith.constant 0 : index
    %2 = vector.load %arg2[%c0_3, %c0_4] : memref<8x1xi32, #tpu.memory_space<vmem>>, vector<8x1xi32>
    %3 = arith.mulf %1, %1 : vector<32x16xf32>
    %cst = arith.constant dense<0.000000e+00> : vector<16xf32>
    %4 = vector.multi_reduction <add>, %3, %cst [0] : vector<32x16xf32> to vector<16xf32>
    %5 = vector.shape_cast %4 : vector<16xf32> to vector<1x16xf32>
    %6 = math.rsqrt %5 : vector<1x16xf32>
    %7 = vector.broadcast %6 : vector<1x16xf32> to vector<32x16xf32>
    %8 = arith.mulf %1, %7 : vector<32x16xf32>
    %9 = arith.mulf %0, %0 : vector<8x32xf32>
    %cst_5 = arith.constant dense<0.000000e+00> : vector<8xf32>
    %10 = vector.multi_reduction <add>, %9, %cst_5 [1] : vector<8x32xf32> to vector<8xf32>
    %11 = vector.shape_cast %10 : vector<8xf32> to vector<8x1xf32>
    %cst_6 = arith.constant dense<0.000000e+00> : vector<8x16xf32>
    %12 = tpu.matmul %0, %8, %cst_6 {dimension_numbers = #tpu.dot_dimension_numbers<[1], [0], [0], [1], [0, 0, 1, 1], [], []>} : vector<8x32xf32>, vector<32x16xf32>, vector<8x16xf32> -> vector<8x16xf32>
    %13 = tpu.iota {dimensions = array<i32: 1>} : vector<8x16xi32>
    %14 = vector.broadcast %2 : vector<8x1xi32> to vector<8x16xi32>
    %15 = arith.cmpi eq, %13, %14 : vector<8x16xi32>
    %16 = arith.mulf %12, %12 : vector<8x16xf32>
    %17 = vector.broadcast %11 : vector<8x1xf32> to vector<8x16xf32>
    %18 = arith.subf %17, %16 : vector<8x16xf32>
    %cst_7 = arith.constant 0.000000e+00 : f32
    %19 = vector.broadcast %cst_7 : f32 to vector<8x16xf32>
    %20 = arith.maximumf %18, %19 : vector<8x16xf32>
    %21 = math.sqrt %20 : vector<8x16xf32>
    %cst_8 = arith.constant 0.122417435 : f32
    %22 = vector.broadcast %cst_8 : f32 to vector<8x16xf32>
    %23 = arith.mulf %12, %22 : vector<8x16xf32>
    %cst_9 = arith.constant 0.47942555 : f32
    %24 = vector.broadcast %cst_9 : f32 to vector<8x16xf32>
    %25 = arith.mulf %21, %24 : vector<8x16xf32>
    %26 = arith.addf %23, %25 : vector<8x16xf32>
    %c0_10 = arith.constant 0 : index
    %c0_11 = arith.constant 0 : index
    %27 = vector.load %arg3[%c0_10, %c0_11] : memref<8x16xf32, #tpu.memory_space<vmem>>, vector<8x16xf32>
    tpu.vector_store %arg3[%c0_10, %c0_11], %12 {strides = array<i32>} : memref<8x16xf32, #tpu.memory_space<vmem>>, vector<8x16xf32>,
    %cst_12 = arith.constant 0.000000e+00 : f32
    %28 = vector.broadcast %cst_12 : f32 to vector<8x16xf32>
    %29 = arith.select %15, %26, %28 : vector<8x16xi1>, vector<8x16xf32>
    %30 = arith.subf %12, %29 : vector<8x16xf32>
    %c0_13 = arith.constant 0 : index
    %c0_14 = arith.constant 0 : index
    %31 = vector.load %arg4[%c0_13, %c0_14] : memref<8x16xf32, #tpu.memory_space<vmem>>, vector<8x16xf32>
    tpu.vector_store %arg4[%c0_13, %c0_14], %30 {strides = array<i32>} : memref<8x16xf32, #tpu.memory_space<vmem>>, vector<8x16xf32>,
    return
  }
}

</mosaic_0001>

<bundles_post_ra>
// kernel: tpu_custom_call.1
= control target key start
LH: loop header
LB: loop body
LE: loop exit
PB: predicated region body
PF: predicated region fallthrough
CT: control target
= control target key end

     0   :  { %10 = vsyncpa [#allocation3], 0  ;;  %vm28_vm0 = vcmask 130048   ;;  %v247_v3 = vmov 0.0   ;;  %vm248_vm1 = vmmov 0   ;;  %s309_s0 = inlined_call_operand.vmem [shape: f32[8,32], index: 0, kind: input, shape index: {}]   ;;  %s310_s1 = inlined_call_operand.vmem [shape: f32[32,16], index: 1, kind: input, shape index: {}]   ;;  %s311_s2 = inlined_call_operand.vmem [shape: s32[8,1], index: 2, kind: input, shape index: {}]   ;;  %s312_s3 = inlined_call_operand.hbm [shape: f32[8,16], index: 3, kind: output, shape index: {0}]   ;;  %s313_s4 = inlined_call_operand.hbm [shape: f32[8,16], index: 4, kind: output, shape index: {1}]  }
   0x1   :  { %v19_v0 = vld [vmem:[%s310_s1] sm:$0xff]  ;;  %v20_v1 = vld [vmem:[%s310_s1 + $0x8] sm:$0xff]  ;;  %v21_v2 = vld [vmem:[%s310_s1 + $0x10] sm:$0xff]  ;;  %182 = vmatprep.subr.mxu0 %v247_v3  ;;  %190 = vmatprep.mubr.msk.f32.mxu0 %vm248_vm1, %v247_v3 }
   0x2   :  { %v22_v4 = vld [vmem:[%s310_s1 + $0x18] sm:$0xff]  ;;  %v24_v5 = vmul.f32 %v19_v0, %v19_v0  ;;  %v25_v6 = vmul.f32 %v20_v1, %v20_v1  ;;  %v26_v7 = vmul.f32 %v21_v2, %v21_v2  ;;  %v18_v8 = vld [vmem:[%s309_s0] sm:$0xff] }
   0x3   :  { %v27_v9 = vmul.f32 %v22_v4, %v22_v4  ;;  %v47_v10 = vmul.f32 %v18_v8, %v18_v8 }
   0x4   :  { %11 = vsyncpa [#allocation5], 0  ;;  %v29_v11 = vsel %vm28_vm0, %v24_v5, 0.0  ;;  %v30_v12 = vsel %vm28_vm0, %v25_v6, 0.0  ;;  %v32_v13 = vsel %vm28_vm0, %v26_v7, 0.0  ;;  %vm48_vm2 = vcmask 261120  }
   0x5   :  { %v249_v14 = vmov 0   ;;  %v31_v15 = vadd.f32 %v30_v12, %v29_v11  ;;  %v49_v16 = vsel %vm48_vm2, %v47_v10, 0.0  ;;  %v34_v17 = vsel %vm28_vm0, %v27_v9, 0.0  ;;  %v23_v26 = vld [vmem:[%s311_s2] sm:$0xff]  ;;  %s250_s25 = smov [#allocation2]  }
   0x6   :  { %198 = vset.pattern.permute.xlu0 %v249_v14  ;;  %s154_s26 = sshll.u32 %s250_s25, 4  ;;  %s155_s26 = int_to_ptr.vmem [resolvable:$true] %s154_s26 }
   0x7   :  { %50 = vadd.xlane.f32.xlu0 %v49_v16  ;;  %v33_v18 = vadd.f32 %v32_v13, %v31_v15  ;;  %s203_s2 = scalar_lea.vmem %s155_s26, 128  ;;  %p208_p1 = scmp.lt.s32.totalorder %s155_s26, %s155_s26 }
   0x8   :  { %p204_p0 = scmp.ne.s32.totalorder %s155_s26, %s203_s2  ;;  %p209_p2 = scmp.lt.s32.totalorder %s203_s2, %s203_s2 }
   0x9   :  { %v35_v19 = vadd.f32 %v34_v17, %v33_v18 }
   0xa   :  { %p210_p3 = por %p209_p2, %p208_p1 }
   0xb   :  { %v36_v20 = vrot.slane %v35_v19, 4 }
   0xc   :  { %p211_p4 = pnand %p210_p3, %p204_p0 }
   0xd   :  { %v37_v21 = vadd.f32 %v36_v20, %v35_v19 }
   0xf   :  { %v38_v22 = vrot.slane %v37_v21, 2 }
  0x11   :  { %v39_v23 = vadd.f32 %v38_v22, %v37_v21 }
  0x13   :  { %v40_v24 = vrot.slane %v39_v23, 1 }
  0x15   :  { %v41_v25 = vadd.f32 %v40_v24, %v39_v23 }
  0x17   :  { %199 = vrsqrt.f32 %v41_v25 }
  0x1d   :  { %128 = vperm.xlu0 %198, %v23_v26  }
  0x24   :  { %v200_v27 = vpop.eup %199 }
  0x25   :  { %v46_v28 = vmul.f32 %v200_v27, %v22_v4  ;;  %v45_v29 = vmul.f32 %v200_v27, %v21_v2  ;;  %v44_v30 = vmul.f32 %v200_v27, %v20_v1  ;;  %v43_v31 = vmul.f32 %v200_v27, %v19_v0 }
  0x27   :  { %183 = vmatpush3.msra.mxu0 %v46_v28 }
  0x28   :  { %184 = vmatprep.subr.mxu0 %v247_v3 }
  0x29   :  { %185 = vmatpush3.msra.mxu0 %v45_v29 }
  0x2a   :  { %186 = vmatprep.subr.mxu0 %v247_v3 }
  0x2b   :  { %187 = vmatpush3.msra.mxu0 %v44_v30 }
  0x2c   :  { %188 = vmatprep.subr.mxu0 %v247_v3 }
  0x2d   :  { %189 = vmatpush3.msra.mxu0 %v43_v31 }
  0x2e   :  { %191 = vmatmul.mubr.msk.f32.vlgmr.msra.gmra.mxu0 %vm48_vm2, %v18_v8 }
  0x90   :  { %v51_v33 = vpop.xlane.xlu0 %50 }
  0xee   :  { %v121_v32 = vpop.f32.mrf.mxu0 }
  0xef   :  { %144 = vst.msk [vmem:[#allocation2] sm:$0xff] %vm28_vm0, %v121_v32  ;;  %v131_v34 = vmul.f32 %v121_v32, %v121_v32 }
  0xf0   :  { %v192_v35 = vpop.f32.mrf.mxu0 }
  0xf1   :  { %214 = shalt.err (!%p211_p4)
}
  0xf2   :  { %157 = dma.vmem_to_hbm [thread:$0]  %s155_s26, 128, %s312_s3, [#allocation3]   ;;  %v132_v36 = vsub.f32 %v51_v33, %v131_v34  ;;  %v125_v38 = vlaneseq  ;;  %v129_v44 = vpop.permute.xlu0 %128  ;;  %v141_v46 = vmul.f32 0.122417435, %v121_v32 }
  0xf3   :  { %s251_s29 = smov [#allocation4]  }
  0xf4   :  { %v133_v37 = vmax.f32 %v132_v36, 0.0  ;;  %v126_v41 = vand.u32 127, %v125_v38  ;;  %s164_s30 = sshll.u32 %s251_s29, 4  ;;  %s165_s30 = int_to_ptr.vmem [resolvable:$true] %s164_s30 }
  0xf5   :  { %s223_s3 = scalar_lea.vmem %s165_s30, 128  ;;  %p228_p6 = scmp.lt.s32.totalorder %s165_s30, %s165_s30 }
  0xf6   :  { %201 = vrsqrt.f32 %v133_v37  ;;  %vm136_vm3 = vcmp.eq.f32.partialorder %v133_v37, inf  ;;  %v139_v42 = vand.u32 2147483648, %v133_v37  ;;  %vm138_vm4 = vcmp.eq.f32.partialorder %v133_v37, 0.0  ;;  %p224_p5 = scmp.ne.s32.totalorder %s165_s30, %s223_s3  ;;  %p229_p7 = scmp.lt.s32.totalorder %s223_s3, %s223_s3 }
  0xf7   :  { %vm130_vm5 = vcmp.eq.s32.totalorder %v126_v41, %v129_v44 }
  0xf8   :  { %p230_p8 = por %p229_p7, %p228_p6 }
  0xfa   :  { %p231_p9 = pnand %p230_p8, %p224_p5 }
 0x103   :  { %v202_v39 = vpop.eup %201 }
 0x104   :  { %v135_v40 = vmul.f32 %v202_v39, %v133_v37 }
 0x106   :  { %v137_v43 = vsel %vm136_vm3, %v133_v37, %v135_v40 }
 0x107   :  { %v140_v45 = vsel %vm138_vm4, %v139_v42, %v137_v43 }
 0x108   :  { %v142_v47 = vmul.f32 0.47942555, %v140_v45 }
 0x10a   :  { %v143_v48 = vadd.f32 %v142_v47, %v141_v46 }
 0x10c   :  { %v145_v49 = vsel %vm130_vm5, %v143_v48, 0.0 }
 0x10d   :  { %v146_v50 = vsub.f32 %v121_v32, %v145_v49 }
 0x10f   :  { %147 = vst.msk [vmem:[#allocation4] sm:$0xff] %vm28_vm0, %v146_v50 }
 0x110   :  { %234 = shalt.err (!%p231_p9)
}
 0x111   :  { %167 = dma.vmem_to_hbm [thread:$0]  %s165_s30, 128, %s313_s4, [#allocation5]  }
 0x112   :  { %243 = dma.done.wait [#allocation3], 128  }
 0x113   :  { %244 = vsyncadd [#allocation3], 4294967168 }
 0x114   :  { %245 = dma.done.wait [#allocation5], 128  }
 0x115   :  { %246 = vsyncadd [#allocation5], 4294967168 }
 0x116   :  { %174 = vsyncpa [#allocation3], 1 }
 0x117   :  { %175 = vsyncpa [#allocation5], 1 }

</bundles_post_ra>
